<compile_context>
chip_gen: v6e
topology: v6e:2x2x1
jax: 0.10.0
libtpu: 0.0.40
codegen_flags: <defaults>
</compile_context>

<pallas_src>
import functools

import jax
import jax.numpy as jnp
from jax.experimental import pallas as pl
from jax.experimental.pallas import tpu as pltpu


def _round_up(x, m):
    return ((x + m - 1) // m) * m


def _distmult_kernel(ridx_ref, h_ref, t_ref, rel_ref, o_ref, *, mode):
    h = h_ref[...].astype(jnp.float32)        # [bn, D]
    t = t_ref[...].astype(jnp.float32)        # [bn, D]
    rel = rel_ref[...].astype(jnp.float32)    # [R, D]   (VMEM-resident, tiny)
    idx = ridx_ref[...]                       # [bn, 1]  int32

    bn, d = h.shape
    nrel = rel.shape[0]

    # In-VMEM gather: r[n, :] = rel_emb[idx[n], :] via one-hot MXU matmul.
    onehot = (idx == jax.lax.broadcasted_iota(jnp.int32, (bn, nrel), 1))
    r = jnp.dot(
        onehot.astype(jnp.float32), rel,
        precision=jax.lax.Precision.HIGHEST,
        preferred_element_type=jnp.float32)   # [bn, D]

    if mode == "head-batch":
        prod = h * (r * t)                    # matches torch: h * (r * t)
    else:
        prod = (h * r) * t                    # matches torch: h * r * t

    # Reduce over D into a lane-dense [1, bn] row:  ones[1,D] . prod[bn,D]^T
    ones_row = jnp.ones((1, d), jnp.float32)
    score_row = jax.lax.dot_general(
        ones_row, prod,
        dimension_numbers=(((1,), (1,)), ((), ())),
        precision=jax.lax.Precision.HIGHEST,
        preferred_element_type=jnp.float32)   # [1, bn]

    o_ref[...] = score_row[None, :, :].astype(o_ref.dtype)


def _pick_block_n(n, d, itemsize, requested):
    # Lane-dense output => block_n must be a multiple of 128.
    bn = _round_up(max(128, min(requested, _round_up(n, 128))), 128)
    # Keep double-buffered h/t/idx/out tiles well inside the scoped-VMEM
    # budget on every generation (v7x has only 64 MiB physical VMEM).
    budget = 24 * 1024 * 1024
    per_row = 2 * (2 * d * itemsize + 4 + 4)  # 2x-buffered h, t, idx, out
    max_bn = max(128, (budget // per_row) // 128 * 128)
    return int(min(bn, max_bn))


@functools.partial(jax.jit, static_argnames=("mode", "block_n"))
def distmult_decoder(h, r_idx, t, rel_emb, mode="tail-batch", *, block_n=512):
    """DistMult scoring: sum over hidden dim of h * rel_emb[r] * t. Returns [N]."""
    assert h.ndim == 2 and t.shape == h.shape
    n, d = h.shape
    num_relations = rel_emb.shape[0]

    block_n = _pick_block_n(n, d, h.dtype.itemsize, block_n)
    n_pad = _round_up(n, block_n)
    pad = n_pad - n
    if pad:
        h = jnp.pad(h, ((0, pad), (0, 0)))
        t = jnp.pad(t, ((0, pad), (0, 0)))
        r_idx = jnp.pad(r_idx, (0, pad))
    r_idx2d = r_idx.astype(jnp.int32).reshape(n_pad, 1)

    n_blocks = n_pad // block_n
    kernel = functools.partial(_distmult_kernel, mode=mode)

    itemsize = h.dtype.itemsize
    cost = pl.CostEstimate(
        flops=int(n_pad * (2 * d + 2 * num_relations * d + 2 * d)),
        transcendentals=0,
        bytes_accessed=int(2 * n_pad * d * itemsize            # h, t
                           + n_pad * 4                          # r indices
                           + num_relations * d * rel_emb.dtype.itemsize
                           + n_pad * itemsize),                 # output
    )

    out = pl.pallas_call(
        kernel,
        out_shape=jax.ShapeDtypeStruct((n_blocks, 1, block_n), h.dtype),
        grid_spec=pltpu.PrefetchScalarGridSpec(
            num_scalar_prefetch=0,
            grid=(n_blocks,),
            in_specs=[
                pl.BlockSpec((block_n, 1), lambda i: (i, 0)),        # r indices
                pl.BlockSpec((block_n, d), lambda i: (i, 0)),        # h
                pl.BlockSpec((block_n, d), lambda i: (i, 0)),        # t
                pl.BlockSpec((num_relations, d), lambda i: (0, 0)),  # rel table
            ],
            out_specs=pl.BlockSpec((1, 1, block_n), lambda i: (i, 0, 0)),
        ),
        compiler_params=pltpu.CompilerParams(
            dimension_semantics=("parallel",),
            vmem_limit_bytes=32 * 1024 * 1024,
        ),
        cost_estimate=cost,
    )(r_idx2d, h, t, rel_emb)

    return out.reshape(n_pad)[:n]


def xavier_uniform(key, shape, dtype=jnp.float32):
    fan_in, fan_out = shape[0], shape[1]
    bound = (6.0 / (fan_in + fan_out)) ** 0.5
    return jax.random.uniform(key, shape, dtype, minval=-bound, maxval=bound)


if __name__ == "__main__":
    num_relations = 6
    hidden_dim = 32
    n_triples = 8

    key = jax.random.PRNGKey(0)
    k_rel, k_h, k_t, k_r = jax.random.split(key, 4)

    # deterministic parameter init (xavier_uniform_, as in the module)
    rel_emb = xavier_uniform(k_rel, (num_relations, hidden_dim))

    h = jax.random.normal(k_h, (n_triples, hidden_dim), jnp.float32)
    t = jax.random.normal(k_t, (n_triples, hidden_dim), jnp.float32)
    r_idx = jax.random.randint(k_r, (n_triples,), 0, num_relations)

    for mode in ("tail-batch", "head-batch"):
        score = distmult_decoder(h, r_idx, t, rel_emb, mode=mode)
        score = jax.block_until_ready(score)

        # reference in plain JAX
        r_emb = rel_emb[r_idx]
        if mode == "head-batch":
            ref = jnp.sum(h * (r_emb * t), axis=1)
        else:
            ref = jnp.sum(h * r_emb * t, axis=1)
        assert score.shape == (n_triples,)
        assert jnp.allclose(score, ref, atol=1e-4, rtol=1e-4), (score, ref)

    print("KERNEL_OK")
</pallas_src>

<mosaic_0001>
module attributes {stable_mosaic.version = 11 : i64} {
  func.func @_distmult_kernel(%arg0: i32, %arg1: memref<128x1xi32, #tpu.memory_space<vmem>>, %arg2: memref<128x32xf32, #tpu.memory_space<vmem>>, %arg3: memref<128x32xf32, #tpu.memory_space<vmem>>, %arg4: memref<6x32xf32, #tpu.memory_space<vmem>>, %arg5: memref<1x1x128xf32, #tpu.memory_space<vmem>>) attributes {dimension_semantics = [#tpu.dimension_semantics<parallel>], iteration_bounds = array<i64: 1>, scalar_prefetch = 0 : i64, scratch_operands = 0 : i64, tpu.core_type = #tpu.core_type<tc>, window_params = [{transform_indices = @transform_0, window_bounds = array<i64: 128, 1>}, {transform_indices = @transform_1, window_bounds = array<i64: 128, 32>}, {transform_indices = @transform_2, window_bounds = array<i64: 128, 32>}, {pipeline_mode = #tpu.pipeline_mode<synchronous>, transform_indices = @transform_3, window_bounds = array<i64: 6, 32>}, {transform_indices = @transform_4, window_bounds = array<i64: 1, 1, 128>}]} {
    %c0 = arith.constant 0 : index
    %c0_0 = arith.constant 0 : index
    %0 = vector.load %arg2[%c0, %c0_0] : memref<128x32xf32, #tpu.memory_space<vmem>>, vector<128x32xf32>
    %c0_1 = arith.constant 0 : index
    %c0_2 = arith.constant 0 : index
    %1 = vector.load %arg3[%c0_1, %c0_2] : memref<128x32xf32, #tpu.memory_space<vmem>>, vector<128x32xf32>
    %c0_3 = arith.constant 0 : index
    %c0_4 = arith.constant 0 : index
    %2 = vector.load %arg4[%c0_3, %c0_4] : memref<6x32xf32, #tpu.memory_space<vmem>>, vector<6x32xf32>
    %c0_5 = arith.constant 0 : index
    %c0_6 = arith.constant 0 : index
    %3 = vector.load %arg1[%c0_5, %c0_6] : memref<128x1xi32, #tpu.memory_space<vmem>>, vector<128x1xi32>
    %4 = tpu.iota {dimensions = array<i32: 1>} : vector<128x6xi32>
    %5 = vector.broadcast %3 : vector<128x1xi32> to vector<128x6xi32>
    %6 = arith.cmpi eq, %5, %4 : vector<128x6xi32>
    %7 = arith.extui %6 : vector<128x6xi1> to vector<128x6xi32>
    %8 = arith.sitofp %7 : vector<128x6xi32> to vector<128x6xf32>
    %cst = arith.constant dense<0.000000e+00> : vector<128x32xf32>
    %9 = tpu.matmul %8, %2, %cst {dimension_numbers = #tpu.dot_dimension_numbers<[1], [0], [0], [1], [0, 0, 1, 1], [], []>, precision = #tpu.contract_precision<fp32>} : vector<128x6xf32>, vector<6x32xf32>, vector<128x32xf32> -> vector<128x32xf32>
    %10 = arith.mulf %0, %9 : vector<128x32xf32>
    %11 = arith.mulf %10, %1 : vector<128x32xf32>
    %cst_7 = arith.constant 1.000000e+00 : f32
    %12 = vector.broadcast %cst_7 : f32 to vector<1x32xf32>
    %cst_8 = arith.constant dense<0.000000e+00> : vector<1x128xf32>
    %13 = tpu.matmul %12, %11, %cst_8 {dimension_numbers = #tpu.dot_dimension_numbers<[1], [1], [0], [0], [0, 0, 1, 0], [], []>, precision = #tpu.contract_precision<fp32>} : vector<1x32xf32>, vector<128x32xf32>, vector<1x128xf32> -> vector<1x128xf32>
    %14 = vector.shape_cast %13 : vector<1x128xf32> to vector<1x1x128xf32>
    %c0_9 = arith.constant 0 : index
    %c0_10 = arith.constant 0 : index
    %c0_11 = arith.constant 0 : index
    %15 = vector.load %arg5[%c0_9, %c0_10, %c0_11] : memref<1x1x128xf32, #tpu.memory_space<vmem>>, vector<1x1x128xf32>
    tpu.vector_store %arg5[%c0_9, %c0_10, %c0_11], %14 {strides = array<i32>} : memref<1x1x128xf32, #tpu.memory_space<vmem>>, vector<1x1x128xf32>,
    return
  }
  func.func @transform_0(%arg0: i32) -> (i32, i32) {
    %c0_i32 = arith.constant 0 : i32
    %c0_i32_0 = arith.constant 0 : i32
    return %arg0, %c0_i32 : i32, i32
  }
  func.func @transform_1(%arg0: i32) -> (i32, i32) {
    %c0_i32 = arith.constant 0 : i32
    %c0_i32_0 = arith.constant 0 : i32
    return %arg0, %c0_i32 : i32, i32
  }
  func.func @transform_2(%arg0: i32) -> (i32, i32) {
    %c0_i32 = arith.constant 0 : i32
    %c0_i32_0 = arith.constant 0 : i32
    return %arg0, %c0_i32 : i32, i32
  }
  func.func @transform_3(%arg0: i32) -> (i32, i32) {
    %c0_i32 = arith.constant 0 : i32
    %c0_i32_0 = arith.constant 0 : i32
    %c0_i32_1 = arith.constant 0 : i32
    return %c0_i32, %c0_i32_0 : i32, i32
  }
  func.func @transform_4(%arg0: i32) -> (i32, i32, i32) {
    %c0_i32 = arith.constant 0 : i32
    %c0_i32_0 = arith.constant 0 : i32
    %c0_i32_1 = arith.constant 0 : i32
    return %arg0, %c0_i32, %c0_i32_0 : i32, i32, i32
  }
}

</mosaic_0001>

<bundles_post_ra>
// kernel: distmult_decoder.1
= control target key start
LH: loop header
LB: loop body
LE: loop exit
PB: predicated region body
PF: predicated region fallthrough
CT: control target
= control target key end

     0   :  { %v2681_v0 = vmov 0   ;;  %vm213_vm0 = vcmask 1045504   ;;  %v66_v24 = vlaneseq  ;;  %vm164_vm1 = vcmask 48128   ;;  %s3674_s0 = inlined_call_operand.vmem [shape: s32[128,1], index: 0, kind: input, shape index: {}]   ;;  %s3675_s3 = inlined_call_operand.vmem [shape: f32[6,32], index: 3, kind: input, shape index: {}]   ;;  %s3676_s1 = inlined_call_operand.vmem [shape: f32[128,32], index: 1, kind: input, shape index: {}]   ;;  %s3677_s2 = inlined_call_operand.vmem [shape: f32[128,32], index: 2, kind: input, shape index: {}]   ;;  %s3678_s4 = inlined_call_operand.vmem [shape: f32[1,1,128], index: 4, kind: output, shape index: {}]  }
   0x1   :  { %2680 = vset.pattern.permute.xlu1 %v2681_v0  ;;  %2679 = vset.pattern.permute.xlu0 %v2681_v0  ;;  %v52_v1 = vld [vmem:[%s3674_s0 + $0x10] sm:$0xff]  ;;  %v50_v2 = vld [vmem:[%s3674_s0] sm:$0xff]  ;;  %v53_v3 = vld [vmem:[%s3674_s0 + $0x18] sm:$0xff]  ;;  %v2682_v28 = vmov 0.0  }
   0x2   :  { %75 = vperm.xlu1 %2680, %v52_v1   ;;  %69 = vperm.xlu0 %2679, %v50_v2   ;;  %v51_v4 = vld [vmem:[%s3674_s0 + $0x8] sm:$0xff]  ;;  %v49_v5 = vld [vmem:[%s3675_s3] sm:$0x3f]  ;;  %v57_v11 = vld [vmem:[%s3674_s0 + $0x38] sm:$0xff]  ;;  %v2777_v25 = vand.u32 127, %v66_v24 }
   0x3   :  { %v55_v6 = vld [vmem:[%s3674_s0 + $0x28] sm:$0xff]  ;;  %v54_v7 = vld [vmem:[%s3674_s0 + $0x20] sm:$0xff]  ;;  %v215_v8 = vsel %vm213_vm0, %v49_v5, 0  ;;  %v56_v12 = vld [vmem:[%s3674_s0 + $0x30] sm:$0xff] }
   0x4   :  { %v2733_v9 = vand.u32 4294901760, %v215_v8  ;;  %v59_v15 = vld [vmem:[%s3674_s0 + $0x48] sm:$0xff]  ;;  %v58_v16 = vld [vmem:[%s3674_s0 + $0x40] sm:$0xff]  ;;  %v61_v18 = vld [vmem:[%s3674_s0 + $0x58] sm:$0xff] }
   0x5   :  { %v60_v19 = vld [vmem:[%s3674_s0 + $0x50] sm:$0xff]  ;;  %v63_v20 = vld [vmem:[%s3674_s0 + $0x68] sm:$0xff]  ;;  %v62_v21 = vld [vmem:[%s3674_s0 + $0x60] sm:$0xff] }
   0x6   :  { %78 = vperm.xlu1 %2680, %v53_v3   ;;  %72 = vperm.xlu0 %2679, %v51_v4   ;;  %v2736_v10 = vsub.f32 %v215_v8, %v2733_v9  ;;  %v65_v22 = vld [vmem:[%s3674_s0 + $0x78] sm:$0xff]  ;;  %v64_v23 = vld [vmem:[%s3674_s0 + $0x70] sm:$0xff] }
   0x7   :  { %2309 = vmatprep.subr.mxu0 %v2733_v9 }
   0x8   :  { %v2746_v13 = vand.u32 4294901760, %v2736_v10  ;;  %2310 = vmatpush3.msra.mxu0 %v2733_v9 }
   0x9   :  { %2361 = vmatprep.subr.mxu0 %v2736_v10 }
   0xa   :  { %84 = vperm.xlu1 %2680, %v55_v6   ;;  %81 = vperm.xlu0 %2679, %v54_v7   ;;  %v477_v14 = vsub.f32 %v2736_v10, %v2746_v13 }
   0xc   :  { %v478_v17 = vand.u32 4294901760, %v477_v14 }
   0xe   :  { %90 = vperm.xlu1 %2680, %v57_v11   ;;  %87 = vperm.xlu0 %2679, %v56_v12  }
   0xf   :  { %2335 = vmatprep.subr.mxu1 %v478_v17 }
  0x10   :  { %2336 = vmatpush3.msra.mxu1 %v478_v17 }
  0x11   :  { %2387 = vmatprep.subr.mxu1 %v2733_v9 }
  0x12   :  { %96 = vperm.xlu1 %2680, %v59_v15   ;;  %93 = vperm.xlu0 %2679, %v58_v16  }
  0x16   :  { %102 = vperm.xlu1 %2680, %v61_v18   ;;  %99 = vperm.xlu0 %2679, %v60_v19  }
  0x1a   :  { %108 = vperm.xlu1 %2680, %v63_v20   ;;  %105 = vperm.xlu0 %2679, %v62_v21  }
  0x1e   :  { %114 = vperm.xlu1 %2680, %v65_v22   ;;  %111 = vperm.xlu0 %2679, %v64_v23  }
  0x7d   :  { %v76_v26 = vpop.permute.xlu1 %75  ;;  %v70_v27 = vpop.permute.xlu0 %69 }
  0x7e   :  { %vm118_vm2 = vcmp.eq.s32.totalorder %v76_v26, %v2777_v25  ;;  %vm116_vm3 = vcmp.eq.s32.totalorder %v70_v27, %v2777_v25 }
  0x7f   :  { %v2782_v29 = vsel %vm118_vm2, 1.0, %v2682_v28  ;;  %v2785_v30 = vsel %vm116_vm3, 1.0, %v2682_v28  ;;  %vm1340_vm3 = vcmask 261120  }
  0x80   :  { %v172_v31 = vsel %vm164_vm1, %v2782_v29, 0  ;;  %2337 = vmatprep.mubr.msk.f32.mxu1 %vm164_vm1, %v2785_v30  ;;  %v166_v32 = vsel %vm164_vm1, %v2785_v30, 0 }
  0x81   :  { %v2793_v33 = vsub.f32 %v172_v31, %v172_v31  ;;  %v79_v34 = vpop.permute.xlu1 %78  ;;  %v73_v35 = vpop.permute.xlu0 %72  ;;  %v2795_v36 = vsub.f32 %v166_v32, %v166_v32 }
  0x82   :  { %vm119_vm4 = vcmp.eq.s32.totalorder %v79_v34, %v2777_v25  ;;  %vm117_vm5 = vcmp.eq.s32.totalorder %v73_v35, %v2777_v25 }
  0x83   :  { %v2800_v37 = vsel %vm119_vm4, 1.0, %v2682_v28  ;;  %v2803_v38 = vsel %vm117_vm5, 1.0, %v2682_v28  ;;  %v285_v39 = vand.u32 4294901760, %v2795_v36  ;;  %v305_v42 = vand.u32 4294901760, %v2793_v33 }
  0x84   :  { %v175_v40 = vsel %vm164_vm1, %v2800_v37, 0  ;;  %v169_v41 = vsel %vm164_vm1, %v2803_v38, 0  ;;  %2338 = vmatmul.mubr.msk.f32.vlgmr.msra.gmra.mxu1 %vm164_vm1, %v2803_v38 }
  0x85   :  { %v2813_v43 = vsub.f32 %v175_v40, %v175_v40  ;;  %v2815_v44 = vsub.f32 %v169_v41, %v169_v41  ;;  %v85_v45 = vpop.permute.xlu1 %84  ;;  %2340 = vmatprep.mubr.msk.f32.mxu1 %vm164_vm1, %v2782_v29  ;;  %v82_v46 = vpop.permute.xlu0 %81  ;;  %v286_v47 = vsub.f32 %v2795_v36, %v285_v39  ;;  %2388 = vmatpush3.msra.mxu1 %v2733_v9 }
  0x86   :  { %vm121_vm6 = vcmp.eq.s32.totalorder %v85_v45, %v2777_v25  ;;  %vm120_vm7 = vcmp.eq.s32.totalorder %v82_v46, %v2777_v25  ;;  %2439 = vmatprep.subr.mxu1 %v2733_v9  ;;  %v306_v54 = vsub.f32 %v2793_v33, %v305_v42 }
  0x87   :  { %v2826_v48 = vsel %vm121_vm6, 1.0, %v2682_v28  ;;  %v2829_v49 = vsel %vm120_vm7, 1.0, %v2682_v28  ;;  %v287_v50 = vand.u32 4294901760, %v286_v47  ;;  %v295_v51 = vand.u32 4294901760, %v2815_v44 }
  0x88   :  { %v181_v52 = vsel %vm164_vm1, %v2826_v48, 0  ;;  %v178_v53 = vsel %vm164_vm1, %v2829_v49, 0  ;;  %2341 = vmatmul.mubr.msk.f32.gmra.mxu1 %vm164_vm1, %v2800_v37  ;;  %v315_v55 = vand.u32 4294901760, %v2813_v43  ;;  %v307_v5 = vand.u32 4294901760, %v306_v54 }
  0x89   :  { %v2843_v56 = vsub.f32 %v181_v52, %v181_v52  ;;  %v2845_v57 = vsub.f32 %v178_v53, %v178_v53  ;;  %v91_v58 = vpop.permute.xlu1 %90  ;;  %2311 = vmatprep.mubr.f32.mxu0 %v287_v50  ;;  %2343 = vmatprep.mubr.msk.f32.mxu1 %vm164_vm1, %v2829_v49  ;;  %v88_v59 = vpop.permute.xlu0 %87  ;;  %v296_v60 = vsub.f32 %v2815_v44, %v295_v51 }
  0x8a   :  { %vm123_vm8 = vcmp.eq.s32.totalorder %v91_v58, %v2777_v25  ;;  %vm122_vm9 = vcmp.eq.s32.totalorder %v88_v59, %v2777_v25  ;;  %v316_v61 = vsub.f32 %v2813_v43, %v315_v55 }
  0x8b   :  { %v2858_v62 = vsel %vm123_vm8, 1.0, %v2682_v28  ;;  %v2861_v63 = vsel %vm122_vm9, 1.0, %v2682_v28  ;;  %v297_v1 = vand.u32 4294901760, %v296_v60  ;;  %v325_v2 = vand.u32 4294901760, %v2845_v57 }
  0x8c   :  { %v187_v3 = vsel %vm164_vm1, %v2858_v62, 0  ;;  %v184_v4 = vsel %vm164_vm1, %v2861_v63, 0  ;;  %2344 = vmatmul.mubr.msk.f32.gmra.mxu1 %vm164_vm1, %v2826_v48  ;;  %v335_v6 = vand.u32 4294901760, %v2843_v56  ;;  %v317_v15 = vand.u32 4294901760, %v316_v61 }
  0x8d   :  { %v2871_v7 = vsub.f32 %v187_v3, %v187_v3  ;;  %v2873_v8 = vsub.f32 %v184_v4, %v184_v4  ;;  %v97_v11 = vpop.permute.xlu1 %96  ;;  %2312 = vmatmul.mubr.f32.vlgmr.msra.gmra.mxu0 %v297_v1  ;;  %2346 = vmatprep.mubr.msk.f32.mxu1 %vm164_vm1, %v2861_v63  ;;  %v94_v12 = vpop.permute.xlu0 %93  ;;  %v326_v14 = vsub.f32 %v2845_v57, %v325_v2 }
  0x8e   :  { %vm125_vm10 = vcmp.eq.s32.totalorder %v97_v11, %v2777_v25  ;;  %2362 = vmatpush3.msra.mxu0 %v2736_v10  ;;  %vm124_vm11 = vcmp.eq.s32.totalorder %v94_v12, %v2777_v25  ;;  %2314 = vmatprep.mubr.f32.mxu0 %v307_v5  ;;  %v336_v16 = vsub.f32 %v2843_v56, %v335_v6 }
  0x8f   :  { %v2887_v17 = vsel %vm125_vm10, 1.0, %v2682_v28  ;;  %v2890_v18 = vsel %vm124_vm11, 1.0, %v2682_v28  ;;  %v327_v19 = vand.u32 4294901760, %v326_v14  ;;  %v345_v20 = vand.u32 4294901760, %v2873_v8  ;;  %2413 = vmatprep.subr.mxu0 %v2746_v13 }
  0x90   :  { %v193_v10 = vsel %vm164_vm1, %v2887_v17, 0  ;;  %v190_v21 = vsel %vm164_vm1, %v2890_v18, 0  ;;  %2347 = vmatmul.mubr.msk.f32.gmra.mxu1 %vm164_vm1, %v2858_v62  ;;  %v355_v22 = vand.u32 4294901760, %v2871_v7  ;;  %v337_v32 = vand.u32 4294901760, %v336_v16 }
  0x91   :  { %v2901_v23 = vsub.f32 %v193_v10, %v193_v10  ;;  %v2903_v24 = vsub.f32 %v190_v21, %v190_v21  ;;  %v103_v26 = vpop.permute.xlu1 %102  ;;  %2315 = vmatmul.mubr.f32.gmra.mxu0 %v317_v15  ;;  %2349 = vmatprep.mubr.msk.f32.mxu1 %vm164_vm1, %v2890_v18  ;;  %v100_v27 = vpop.permute.xlu0 %99  ;;  %v346_v31 = vsub.f32 %v2873_v8, %v345_v20 }
  0x92   :  { %vm127_vm12 = vcmp.eq.s32.totalorder %v103_v26, %v2777_v25  ;;  %vm126_vm13 = vcmp.eq.s32.totalorder %v100_v27, %v2777_v25  ;;  %2317 = vmatprep.mubr.f32.mxu0 %v327_v19  ;;  %v356_v34 = vsub.f32 %v2871_v7, %v355_v22 }
  0x93   :  { %v2916_v35 = vsel %vm127_vm12, 1.0, %v2682_v28  ;;  %v2919_v40 = vsel %vm126_vm13, 1.0, %v2682_v28  ;;  %v347_v41 = vand.u32 4294901760, %v346_v31  ;;  %v365_v45 = vand.u32 4294901760, %v2903_v24 }
  0x94   :  { %v199_v46 = vsel %vm164_vm1, %v2916_v35, 0  ;;  %v196_v47 = vsel %vm164_vm1, %v2919_v40, 0  ;;  %2350 = vmatmul.mubr.msk.f32.gmra.mxu1 %vm164_vm1, %v2887_v17  ;;  %v375_v50 = vand.u32 4294901760, %v2901_v23  ;;  %v357_v60 = vand.u32 4294901760, %v356_v34 }
  0x95   :  { %v2929_v52 = vsub.f32 %v199_v46, %v199_v46  ;;  %v2931_v53 = vsub.f32 %v196_v47, %v196_v47  ;;  %v109_v54 = vpop.permute.xlu1 %108  ;;  %2318 = vmatmul.mubr.f32.gmra.mxu0 %v337_v32  ;;  %2352 = vmatprep.mubr.msk.f32.mxu1 %vm164_vm1, %v2919_v40  ;;  %v106_v58 = vpop.permute.xlu0 %105  ;;  %v366_v59 = vsub.f32 %v2903_v24, %v365_v45 }
  0x96   :  { %vm129_vm14 = vcmp.eq.s32.totalorder %v109_v54, %v2777_v25  ;;  %vm128_vm15 = vcmp.eq.s32.totalorder %v106_v58, %v2777_v25  ;;  %2320 = vmatprep.mubr.f32.mxu0 %v347_v41  ;;  %v376_v61 = vsub.f32 %v2901_v23, %v375_v50 }
  0x97   :  { %v2944_v1 = vsel %vm129_vm14, 1.0, %v2682_v28  ;;  %v2947_v3 = vsel %vm128_vm15, 1.0, %v2682_v28  ;;  %v367_v4 = vand.u32 4294901760, %v366_v59  ;;  %v385_v5 = vand.u32 4294901760, %v2931_v53 }
  0x98   :  { %v205_v11 = vsel %vm164_vm1, %v2944_v1, 0  ;;  %v202_v12 = vsel %vm164_vm1, %v2947_v3, 0  ;;  %2353 = vmatmul.mubr.msk.f32.gmra.mxu1 %vm164_vm1, %v2916_v35  ;;  %v395_v14 = vand.u32 4294901760, %v2929_v52  ;;  %v377_v26 = vand.u32 4294901760, %v376_v61 }
  0x99   :  { %v2957_v15 = vsub.f32 %v205_v11, %v205_v11  ;;  %v2959_v16 = vsub.f32 %v202_v12, %v202_v12  ;;  %v115_v19 = vpop.permute.xlu1 %114  ;;  %2321 = vmatmul.mubr.f32.gmra.mxu0 %v357_v60  ;;  %2355 = vmatprep.mubr.msk.f32.mxu1 %vm164_vm1, %v2947_v3  ;;  %v112_v10 = vpop.permute.xlu0 %111  ;;  %v386_v21 = vsub.f32 %v2931_v53, %v385_v5 }
  0x9a   :  { %vm131_vm0 = vcmp.eq.s32.totalorder %v115_v19, %v2777_v25  ;;  %vm130_vm2 = vcmp.eq.s32.totalorder %v112_v10, %v2777_v25  ;;  %2323 = vmatprep.mubr.f32.mxu0 %v367_v4  ;;  %v396_v27 = vsub.f32 %v2929_v52, %v395_v14 }
  0x9b   :  { %v2972_v31 = vsel %vm131_vm0, 1.0, %v2682_v28  ;;  %v2975_v32 = vsel %vm130_vm2, 1.0, %v2682_v28  ;;  %v387_v34 = vand.u32 4294901760, %v386_v21  ;;  %v405_v41 = vand.u32 4294901760, %v2959_v16 }
  0x9c   :  { %v211_v46 = vsel %vm164_vm1, %v2972_v31, 0  ;;  %v208_v25 = vsel %vm164_vm1, %v2975_v32, 0  ;;  %2356 = vmatmul.mubr.msk.f32.gmra.mxu1 %vm164_vm1, %v2944_v1  ;;  %v415_v47 = vand.u32 4294901760, %v2957_v15  ;;  %v397_v60 = vand.u32 4294901760, %v396_v27 }
  0x9d   :  { %v434_v54 = vsub.f32 %v211_v46, %v211_v46  ;;  %v424_v58 = vsub.f32 %v208_v25, %v208_v25  ;;  %2324 = vmatmul.mubr.f32.gmra.mxu0 %v377_v26  ;;  %2358 = vmatprep.mubr.msk.f32.mxu1 %vm164_vm1, %v2975_v32  ;;  %v406_v59 = vsub.f32 %v2959_v16, %v405_v41 }
  0x9e   :  { %2326 = vmatprep.mubr.f32.mxu0 %v387_v34  ;;  %v416_v4 = vsub.f32 %v2957_v15, %v415_v47 }
  0x9f   :  { %v407_v61 = vand.u32 4294901760, %v406_v59  ;;  %v425_v11 = vand.u32 4294901760, %v424_v58  ;;  %v435_v12 = vand.u32 4294901760, %v434_v54 }
  0xa0   :  { %2359 = vmatmul.mubr.msk.f32.gmra.mxu1 %vm164_vm1, %v2972_v31  ;;  %v417_v10 = vand.u32 4294901760, %v416_v4 }
  0xa1   :  { %2327 = vmatmul.mubr.f32.gmra.mxu0 %v397_v60  ;;  %2389 = vmatprep.mubr.f32.mxu1 %v285_v39  ;;  %v426_v19 = vsub.f32 %v424_v58, %v425_v11  ;;  %v436_v26 = vsub.f32 %v434_v54, %v435_v12 }
  0xa2   :  { %2329 = vmatprep.mubr.f32.mxu0 %v407_v61 }
  0xa3   :  { %v427_v21 = vand.u32 4294901760, %v426_v19  ;;  %v437_v27 = vand.u32 4294901760, %v436_v26 }
  0xa4   :  { %2390 = vmatmul.mubr.f32.vlgmr.msra.gmra.mxu1 %v295_v51 }
  0xa5   :  { %2330 = vmatmul.mubr.f32.gmra.mxu0 %v417_v10  ;;  %2392 = vmatprep.mubr.f32.mxu1 %v305_v42 }
  0xa6   :  { %2332 = vmatprep.mubr.f32.mxu0 %v427_v21  ;;  %2440 = vmatpush3.msra.mxu1 %v2733_v9 }
  0xa7   :  { %2500 = vmatprep.subr.mxu1 %v2682_v28 }
  0xa8   :  { %2393 = vmatmul.mubr.f32.gmra.mxu1 %v315_v55 }
  0xa9   :  { %2333 = vmatmul.mubr.f32.gmra.mxu0 %v437_v27  ;;  %2395 = vmatprep.mubr.f32.mxu1 %v325_v2 }
  0xaa   :  { %2363 = vmatprep.mubr.f32.mxu0 %v2795_v36 }
  0xac   :  { %2396 = vmatmul.mubr.f32.gmra.mxu1 %v335_v6 }
  0xad   :  { %2364 = vmatmul.mubr.f32.vlgmr.msra.gmra.mxu0 %v2815_v44  ;;  %2398 = vmatprep.mubr.f32.mxu1 %v345_v20 }
  0xae   :  { %2414 = vmatpush3.msra.mxu0 %v2746_v13  ;;  %2366 = vmatprep.mubr.f32.mxu0 %v2793_v33 }
  0xaf   :  { %2465 = vmatprep.subr.mxu0 %v2682_v28 }
  0xb0   :  { %2399 = vmatmul.mubr.f32.gmra.mxu1 %v355_v22 }
  0xb1   :  { %2367 = vmatmul.mubr.f32.gmra.mxu0 %v2813_v43  ;;  %2401 = vmatprep.mubr.f32.mxu1 %v365_v45 }
  0xb2   :  { %2369 = vmatprep.mubr.f32.mxu0 %v2845_v57 }
  0xb4   :  { %2402 = vmatmul.mubr.f32.gmra.mxu1 %v375_v50 }
  0xb5   :  { %2370 = vmatmul.mubr.f32.gmra.mxu0 %v2843_v56  ;;  %2404 = vmatprep.mubr.f32.mxu1 %v385_v5 }
  0xb6   :  { %2372 = vmatprep.mubr.f32.mxu0 %v2873_v8 }
  0xb8   :  { %2405 = vmatmul.mubr.f32.gmra.mxu1 %v395_v14 }
  0xb9   :  { %2373 = vmatmul.mubr.f32.gmra.mxu0 %v2871_v7  ;;  %2407 = vmatprep.mubr.f32.mxu1 %v405_v41 }
  0xba   :  { %2375 = vmatprep.mubr.f32.mxu0 %v2903_v24 }
  0xbc   :  { %2408 = vmatmul.mubr.f32.gmra.mxu1 %v415_v47 }
  0xbd   :  { %2376 = vmatmul.mubr.f32.gmra.mxu0 %v2901_v23  ;;  %2410 = vmatprep.mubr.f32.mxu1 %v425_v11 }
  0xbe   :  { %2378 = vmatprep.mubr.f32.mxu0 %v2931_v53 }
  0xc0   :  { %2411 = vmatmul.mubr.f32.gmra.mxu1 %v435_v12 }
  0xc1   :  { %2379 = vmatmul.mubr.f32.gmra.mxu0 %v2929_v52  ;;  %2441 = vmatprep.mubr.msk.f32.mxu1 %vm164_vm1, %v2785_v30 }
  0xc2   :  { %2381 = vmatprep.mubr.f32.mxu0 %v2959_v16 }
  0xc4   :  { %2442 = vmatmul.mubr.msk.f32.vlgmr.msra.gmra.mxu1 %vm164_vm1, %v2803_v38 }
  0xc5   :  { %2382 = vmatmul.mubr.f32.gmra.mxu0 %v2957_v15  ;;  %2444 = vmatprep.mubr.msk.f32.mxu1 %vm164_vm1, %v2782_v29 }
  0xc6   :  { %2384 = vmatprep.mubr.f32.mxu0 %v424_v58 }
  0xc8   :  { %2445 = vmatmul.mubr.msk.f32.gmra.mxu1 %vm164_vm1, %v2800_v37 }
  0xc9   :  { %2385 = vmatmul.mubr.f32.gmra.mxu0 %v434_v54  ;;  %2447 = vmatprep.mubr.msk.f32.mxu1 %vm164_vm1, %v2829_v49 }
  0xca   :  { %2415 = vmatprep.mubr.msk.f32.mxu0 %vm164_vm1, %v2785_v30 }
  0xcc   :  { %2448 = vmatmul.mubr.msk.f32.gmra.mxu1 %vm164_vm1, %v2826_v48 }
  0xcd   :  { %2416 = vmatmul.mubr.msk.f32.vlgmr.msra.gmra.mxu0 %vm164_vm1, %v2803_v38  ;;  %2450 = vmatprep.mubr.msk.f32.mxu1 %vm164_vm1, %v2861_v63 }
  0xce   :  { %2418 = vmatprep.mubr.msk.f32.mxu0 %vm164_vm1, %v2782_v29 }
  0xd0   :  { %2451 = vmatmul.mubr.msk.f32.gmra.mxu1 %vm164_vm1, %v2858_v62 }
  0xd1   :  { %2419 = vmatmul.mubr.msk.f32.gmra.mxu0 %vm164_vm1, %v2800_v37  ;;  %2453 = vmatprep.mubr.msk.f32.mxu1 %vm164_vm1, %v2890_v18 }
  0xd2   :  { %2421 = vmatprep.mubr.msk.f32.mxu0 %vm164_vm1, %v2829_v49 }
  0xd4   :  { %2454 = vmatmul.mubr.msk.f32.gmra.mxu1 %vm164_vm1, %v2887_v17 }
  0xd5   :  { %2422 = vmatmul.mubr.msk.f32.gmra.mxu0 %vm164_vm1, %v2826_v48  ;;  %2456 = vmatprep.mubr.msk.f32.mxu1 %vm164_vm1, %v2919_v40 }
  0xd6   :  { %2424 = vmatprep.mubr.msk.f32.mxu0 %vm164_vm1, %v2861_v63 }
  0xd8   :  { %2457 = vmatmul.mubr.msk.f32.gmra.mxu1 %vm164_vm1, %v2916_v35 }
  0xd9   :  { %2425 = vmatmul.mubr.msk.f32.gmra.mxu0 %vm164_vm1, %v2858_v62  ;;  %2459 = vmatprep.mubr.msk.f32.mxu1 %vm164_vm1, %v2947_v3 }
  0xda   :  { %2427 = vmatprep.mubr.msk.f32.mxu0 %vm164_vm1, %v2890_v18 }
  0xdc   :  { %2460 = vmatmul.mubr.msk.f32.gmra.mxu1 %vm164_vm1, %v2944_v1 }
  0xdd   :  { %2428 = vmatmul.mubr.msk.f32.gmra.mxu0 %vm164_vm1, %v2887_v17  ;;  %2462 = vmatprep.mubr.msk.f32.mxu1 %vm164_vm1, %v2975_v32 }
  0xde   :  { %2430 = vmatprep.mubr.msk.f32.mxu0 %vm164_vm1, %v2919_v40 }
  0xe0   :  { %2463 = vmatmul.mubr.msk.f32.gmra.mxu1 %vm164_vm1, %v2972_v31 }
  0xe1   :  { %2431 = vmatmul.mubr.msk.f32.gmra.mxu0 %vm164_vm1, %v2916_v35 }
  0xe2   :  { %2433 = vmatprep.mubr.msk.f32.mxu0 %vm164_vm1, %v2947_v3 }
  0xe5   :  { %2434 = vmatmul.mubr.msk.f32.gmra.mxu0 %vm164_vm1, %v2944_v1 }
  0xe6   :  { %2436 = vmatprep.mubr.msk.f32.mxu0 %vm164_vm1, %v2975_v32 }
  0xe9   :  { %2437 = vmatmul.mubr.msk.f32.gmra.mxu0 %vm164_vm1, %v2972_v31  ;;  %vm2683_vm1 = vmmov 0  }
  0xea   :  { %2497 = vmatprep.mubr.msk.f32.mxu0 %vm2683_vm1, %v2682_v28  ;;  %2532 = vmatprep.mubr.msk.f32.mxu1 %vm2683_vm1, %v2682_v28 }
 0x144   :  { %v2339_v9 = vpop.f32.mrf.mxu1 }
 0x146   :  { %v515_v13 = vpop.f32.mrf.mxu1 }
 0x148   :  { %v2342_v29 = vpop.f32.mrf.mxu1 }
 0x14a   :  { %v527_v30 = vpop.f32.mrf.mxu1 }
 0x14c   :  { %v2345_v33 = vpop.f32.mrf.mxu1 }
 0x14d   :  { %v2313_v36 = vpop.f32.mrf.mxu0 }
 0x14e   :  { %v522_v37 = vadd.f32 %v2339_v9, %v2313_v36  ;;  %v539_v38 = vpop.f32.mrf.mxu1 }
 0x14f   :  { %v289_v39 = vpop.f32.mrf.mxu0 }
 0x150   :  { %v516_v42 = vadd.f32 %v515_v13, %v289_v39  ;;  %v2348_v43 = vpop.f32.mrf.mxu1 }
 0x151   :  { %v2316_v44 = vpop.f32.mrf.mxu0 }
 0x152   :  { %v534_v48 = vadd.f32 %v2342_v29, %v2316_v44  ;;  %v551_v49 = vpop.f32.mrf.mxu1 }
 0x153   :  { %v309_v51 = vpop.f32.mrf.mxu0 }
 0x154   :  { %v528_v55 = vadd.f32 %v527_v30, %v309_v51  ;;  %v2351_v56 = vpop.f32.mrf.mxu1 }
 0x155   :  { %v2319_v57 = vpop.f32.mrf.mxu0 }
 0x156   :  { %v546_v62 = vadd.f32 %v2345_v33, %v2319_v57  ;;  %v563_v63 = vpop.f32.mrf.mxu1 }
 0x157   :  { %v329_v2 = vpop.f32.mrf.mxu0 }
 0x158   :  { %v540_v6 = vadd.f32 %v539_v38, %v329_v2  ;;  %v2354_v7 = vpop.f32.mrf.mxu1 }
 0x159   :  { %v2322_v8 = vpop.f32.mrf.mxu0 }
 0x15a   :  { %v558_v17 = vadd.f32 %v2348_v43, %v2322_v8  ;;  %v575_v18 = vpop.f32.mrf.mxu1 }
 0x15b   :  { %v349_v20 = vpop.f32.mrf.mxu0 }
 0x15c   :  { %v552_v22 = vadd.f32 %v551_v49, %v349_v20  ;;  %v2357_v23 = vpop.f32.mrf.mxu1 }
 0x15d   :  { %v2325_v24 = vpop.f32.mrf.mxu0 }
 0x15e   :  { %v570_v35 = vadd.f32 %v2351_v56, %v2325_v24  ;;  %v587_v40 = vpop.f32.mrf.mxu1 }
 0x15f   :  { %v369_v45 = vpop.f32.mrf.mxu0 }
 0x160   :  { %v564_v50 = vadd.f32 %v563_v63, %v369_v45  ;;  %v3097_v52 = vpop.f32.mrf.mxu1 }
 0x161   :  { %v2328_v53 = vpop.f32.mrf.mxu0 }
 0x162   :  { %v3099_v1 = vadd.f32 %v2354_v7, %v2328_v53  ;;  %v3101_v3 = vpop.f32.mrf.mxu1 }
 0x163   :  { %v389_v5 = vpop.f32.mrf.mxu0 }
 0x164   :  { %v3103_v14 = vadd.f32 %v575_v18, %v389_v5  ;;  %v2391_v15 = vpop.f32.mrf.mxu1 }
 0x165   :  { %v2331_v16 = vpop.f32.mrf.mxu0 }
 0x166   :  { %v3105_v31 = vadd.f32 %v2357_v23, %v2331_v16  ;;  %v858_v32 = vpop.f32.mrf.mxu1 }
 0x167   :  { %v409_v34 = vpop.f32.mrf.mxu0 }
 0x168   :  { %v3107_v41 = vadd.f32 %v587_v40, %v409_v34  ;;  %v2394_v46 = vpop.f32.mrf.mxu1 }
 0x169   :  { %v3109_v25 = vpop.f32.mrf.mxu0 }
 0x16a   :  { %v874_v47 = vpop.f32.mrf.mxu1 }
 0x16b   :  { %v3111_v54 = vpop.f32.mrf.mxu0 }
 0x16c   :  { %v2397_v58 = vpop.f32.mrf.mxu1 }
 0x16d   :  { %v2365_v59 = vpop.f32.mrf.mxu0 }
 0x16e   :  { %v687_v60 = vadd.f32 %v2365_v59, %v522_v37  ;;  %v890_v61 = vpop.f32.mrf.mxu1 }
 0x16f   :  { %v679_v4 = vpop.f32.mrf.mxu0 }
 0x170   :  { %v680_v11 = vadd.f32 %v679_v4, %v516_v42  ;;  %v2400_v12 = vpop.f32.mrf.mxu1  ;;  %v867_v19 = vadd.f32 %v2391_v15, %v687_v60 }
 0x171   :  { %v2368_v10 = vpop.f32.mrf.mxu0 }
 0x172   :  { %v701_v21 = vadd.f32 %v2368_v10, %v534_v48  ;;  %v906_v26 = vpop.f32.mrf.mxu1  ;;  %v859_v27 = vadd.f32 %v858_v32, %v680_v11 }
 0x173   :  { %v693_v9 = vpop.f32.mrf.mxu0 }
 0x174   :  { %v694_v13 = vadd.f32 %v693_v9, %v528_v55  ;;  %v2403_v29 = vpop.f32.mrf.mxu1  ;;  %v883_v30 = vadd.f32 %v2394_v46, %v701_v21 }
 0x175   :  { %v2371_v33 = vpop.f32.mrf.mxu0 }
 0x176   :  { %v715_v36 = vadd.f32 %v2371_v33, %v546_v62  ;;  %v922_v37 = vpop.f32.mrf.mxu1  ;;  %v875_v38 = vadd.f32 %v874_v47, %v694_v13 }
 0x177   :  { %v707_v39 = vpop.f32.mrf.mxu0 }
 0x178   :  { %v708_v42 = vadd.f32 %v707_v39, %v540_v6  ;;  %v3117_v43 = vpop.f32.mrf.mxu1  ;;  %v3119_v44 = vadd.f32 %v2397_v58, %v715_v36 }
 0x179   :  { %v2374_v48 = vpop.f32.mrf.mxu0 }
 0x17a   :  { %v729_v49 = vadd.f32 %v2374_v48, %v558_v17  ;;  %v3121_v51 = vpop.f32.mrf.mxu1  ;;  %v3123_v56 = vadd.f32 %v890_v61, %v708_v42 }
 0x17b   :  { %v721_v57 = vpop.f32.mrf.mxu0 }
 0x17c   :  { %v722_v55 = vadd.f32 %v721_v57, %v552_v22  ;;  %v2409_v63 = vpop.f32.mrf.mxu1  ;;  %v3125_v2 = vadd.f32 %v2400_v12, %v729_v49 }
 0x17d   :  { %v2377_v62 = vpop.f32.mrf.mxu0 }
 0x17e   :  { %v743_v7 = vadd.f32 %v2377_v62, %v570_v35  ;;  %v954_v8 = vpop.f32.mrf.mxu1  ;;  %v3127_v18 = vadd.f32 %v906_v26, %v722_v55 }
 0x17f   :  { %v735_v6 = vpop.f32.mrf.mxu0 }
 0x180   :  { %v736_v20 = vadd.f32 %v735_v6, %v564_v50  ;;  %v3129_v23 = vpop.f32.mrf.mxu1  ;;  %v3131_v24 = vadd.f32 %v2403_v29, %v743_v7  ;;  %v606_v6 = vadd.f32 %v3097_v52, %v3109_v25  ;;  %v30_v52 = vld [vmem:[%s3676_s1 + $0x68] sm:$0xff] }
 0x181   :  { %v2380_v17 = vpop.f32.mrf.mxu0 }
 0x182   :  { %v3133_v40 = vpop.f32.mrf.mxu1  ;;  %v3135_v45 = vadd.f32 %v922_v37, %v736_v20 }
 0x183   :  { %v749_v22 = vpop.f32.mrf.mxu0 }
 0x184   :  { %v2443_v53 = vpop.f32.mrf.mxu1 }
 0x185   :  { %v2383_v5 = vpop.f32.mrf.mxu0 }
 0x186   :  { %v1214_v15 = vpop.f32.mrf.mxu1  ;;  %v771_v55 = vadd.f32 %v2383_v5, %v3105_v31 }
 0x187   :  { %v763_v16 = vpop.f32.mrf.mxu0 }
 0x188   :  { %v2446_v35 = vpop.f32.mrf.mxu1  ;;  %v764_v20 = vadd.f32 %v763_v16, %v3107_v41 }
 0x189   :  { %v2386_v32 = vpop.f32.mrf.mxu0 }
 0x18a   :  { %v1226_v34 = vpop.f32.mrf.mxu1 }
 0x18b   :  { %v777_v46 = vpop.f32.mrf.mxu0 }
 0x18c   :  { %v3137_v47 = vpop.f32.mrf.mxu1 }
 0x18d   :  { %v2417_v50 = vpop.f32.mrf.mxu0 }
 0x18e   :  { %v1059_v58 = vadd.f32 %v2417_v50, %v867_v19  ;;  %v3139_v59 = vpop.f32.mrf.mxu1  ;;  %v963_v50 = vadd.f32 %v2409_v63, %v771_v55  ;;  %v29_v63 = vld [vmem:[%s3676_s1 + $0x60] sm:$0xff] }
 0x18f   :  { %v1052_v60 = vpop.f32.mrf.mxu0 }
 0x190   :  { %v3141_v61 = vadd.f32 %v2443_v53, %v1059_v58  ;;  %v1053_v4 = vadd.f32 %v1052_v60, %v859_v27  ;;  %v3143_v11 = vpop.f32.mrf.mxu1  ;;  %v600_v53 = vadd.f32 %v3101_v3, %v3111_v54  ;;  %v750_v58 = vadd.f32 %v749_v22, %v3103_v14  ;;  %v46_v14 = vld [vmem:[%s3677_s2 + $0x68] sm:$0xff] }
 0x191   :  { %v2420_v12 = vpop.f32.mrf.mxu0 }
 0x192   :  { %v3145_v10 = vadd.f32 %v1214_v15, %v1053_v4  ;;  %v1071_v21 = vadd.f32 %v2420_v12, %v883_v30  ;;  %v3147_v26 = vpop.f32.mrf.mxu1  ;;  %v955_v4 = vadd.f32 %v954_v8, %v764_v20  ;;  %v31_v20 = vld [vmem:[%s3676_s1 + $0x70] sm:$0xff] }
 0x193   :  { %v1064_v9 = vpop.f32.mrf.mxu0 }
 0x194   :  { %v3149_v13 = vadd.f32 %v2446_v35, %v1071_v21  ;;  %v1065_v29 = vadd.f32 %v1064_v9, %v875_v38  ;;  %v3151_v33 = vpop.f32.mrf.mxu1  ;;  %v757_v38 = vadd.f32 %v2380_v17, %v3099_v1  ;;  %v785_v35 = vadd.f32 %v2386_v32, %v606_v6  ;;  %v32_v9 = vld [vmem:[%s3676_s1 + $0x78] sm:$0xff] }
 0x195   :  { %v3153_v19 = vpop.f32.mrf.mxu0  ;;  %v778_v1 = vadd.f32 %v777_v46, %v600_v53 }
 0x196   :  { %v3155_v36 = vadd.f32 %v1226_v34, %v1065_v29  ;;  %v3157_v37 = vpop.f32.mrf.mxu1  ;;  %v947_v34 = vadd.f32 %v3117_v43, %v757_v38  ;;  %v979_v54 = vadd.f32 %v3129_v23, %v785_v35  ;;  %v939_v43 = vadd.f32 %v3121_v51, %v750_v58  ;;  %v28_v23 = vld [vmem:[%s3676_s1 + $0x58] sm:$0xff] }
 0x197   :  { %v3159_v27 = vpop.f32.mrf.mxu0  ;;  %v971_v22 = vadd.f32 %v3133_v40, %v778_v1  ;;  %v45_v40 = vld [vmem:[%s3677_s2 + $0x60] sm:$0xff]  ;;  %v47_v1 = vld [vmem:[%s3677_s2 + $0x70] sm:$0xff] }
 0x198   :  { %v2458_v39 = vpop.f32.mrf.mxu1 }
 0x199   :  { %v3161_v42 = vpop.f32.mrf.mxu0 }
 0x19a   :  { %v1274_v48 = vpop.f32.mrf.mxu1 }
 0x19b   :  { %v3163_v30 = vpop.f32.mrf.mxu0 }
 0x19c   :  { %v2461_v62 = vpop.f32.mrf.mxu1 }
 0x19d   :  { %v2429_v49 = vpop.f32.mrf.mxu0 }
 0x19e   :  { %v1286_v17 = vpop.f32.mrf.mxu1  ;;  %v1107_v53 = vadd.f32 %v2429_v49, %v3131_v24  ;;  %v27_v24 = vld [vmem:[%s3676_s1 + $0x50] sm:$0xff] }
 0x19f   :  { %v3165_v57 = vpop.f32.mrf.mxu0 }
 0x1a0   :  { %v2464_v16 = vpop.f32.mrf.mxu1  ;;  %v1269_v49 = vadd.f32 %v3151_v33, %v1107_v53 }
 0x1a1   :  { %v2432_v7 = vpop.f32.mrf.mxu0 }
 0x1a2   :  { %v1119_v5 = vadd.f32 %v2432_v7, %v947_v34  ;;  %v1298_v6 = vpop.f32.mrf.mxu1 }
 0x1a3   :  { %v1112_v15 = vpop.f32.mrf.mxu0 }
 0x1a4   :  { %v1281_v32 = vadd.f32 %v2458_v39, %v1119_v5  ;;  %v1113_v51 = vadd.f32 %v1112_v15, %v939_v43  ;;  %v48_v39 = vld [vmem:[%s3677_s2 + $0x78] sm:$0xff] }
 0x1a5   :  { %v2435_v31 = vpop.f32.mrf.mxu0 }
 0x1a6   :  { %v1131_v60 = vadd.f32 %v2435_v31, %v963_v50  ;;  %v1319_v15 = vmul.f32 %v1281_v32, %v28_v23  ;;  %v44_v50 = vld [vmem:[%s3677_s2 + $0x58] sm:$0xff]  ;;  %v1275_v58 = vadd.f32 %v1274_v48, %v1113_v51  ;;  %v26_v48 = vld [vmem:[%s3676_s1 + $0x48] sm:$0xff]  ;;  %v25_v51 = vld [vmem:[%s3676_s1 + $0x40] sm:$0xff] }
 0x1a7   :  { %v1124_v41 = vpop.f32.mrf.mxu0  ;;  %v42_v32 = vld [vmem:[%s3677_s2 + $0x48] sm:$0xff] }
 0x1a8   :  { %v1293_v25 = vadd.f32 %v2461_v62, %v1131_v60  ;;  %v1125_v3 = vadd.f32 %v1124_v41, %v955_v4  ;;  %v1335_v4 = vmul.f32 %v1319_v15, %v44_v50  ;;  %v41_v15 = vld [vmem:[%s3677_s2 + $0x40] sm:$0xff]  ;;  %v40_v50 = vld [vmem:[%s3677_s2 + $0x38] sm:$0xff] }
 0x1a9   :  { %v2438_v8 = vpop.f32.mrf.mxu0 }
 0x1aa   :  { %v1321_v46 = vmul.f32 %v1293_v25, %v30_v52  ;;  %v1287_v12 = vadd.f32 %v1286_v17, %v1125_v3  ;;  %v1143_v21 = vadd.f32 %v2438_v8, %v979_v54  ;;  %v1101_v54 = vadd.f32 %v3165_v57, %v3135_v45 }
 0x1ab   :  { %v1136_v29 = vpop.f32.mrf.mxu0  ;;  %v1317_v45 = vmul.f32 %v1269_v49, %v26_v48  ;;  %v1378_v57 = vsel %vm1340_vm3, %v1335_v4, 0  ;;  %v1077_v48 = vadd.f32 %v3159_v27, %v3123_v56  ;;  %v38_v27 = vld [vmem:[%s3677_s2 + $0x28] sm:$0xff] }
 0x1ac   :  { %v1337_v38 = vmul.f32 %v1321_v46, %v46_v14  ;;  %v1320_v55 = vmul.f32 %v1287_v12, %v29_v63  ;;  %v1305_v62 = vadd.f32 %v2464_v16, %v1143_v21  ;;  %v1137_v7 = vadd.f32 %v1136_v29, %v971_v22  ;;  %v43_v14 = vld [vmem:[%s3677_s2 + $0x50] sm:$0xff] }
 0x1ad   :  { %v1318_v16 = vmul.f32 %v1275_v58, %v27_v24  ;;  %v1095_v22 = vadd.f32 %v3161_v42, %v3125_v2  ;;  %v1263_v2 = vadd.f32 %v3157_v37, %v1101_v54  ;;  %v24_v37 = vld [vmem:[%s3676_s1 + $0x38] sm:$0xff] }
 0x1ae   :  { %v1323_v35 = vmul.f32 %v1305_v62, %v32_v9  ;;  %v1299_v34 = vadd.f32 %v1298_v6, %v1137_v7  ;;  %v1336_v17 = vmul.f32 %v1320_v55, %v45_v40  ;;  %v1384_v60 = vsel %vm1340_vm3, %v1337_v38, 0 }
 0x1af   :  { %v3221_v3 = vand.u32 4294901760, %v1384_v60  ;;  %v1334_v42 = vmul.f32 %v1318_v16, %v43_v14  ;;  %v1257_v38 = vadd.f32 %v3143_v11, %v1095_v22  ;;  %v1333_v55 = vmul.f32 %v1317_v45, %v42_v32 }
 0x1b0   :  { %v1339_v31 = vmul.f32 %v1323_v35, %v48_v39  ;;  %v1322_v5 = vmul.f32 %v1299_v34, %v31_v20  ;;  %v1381_v33 = vsel %vm1340_vm3, %v1336_v17, 0  ;;  %v3263_v62 = vand.u32 4294901760, %v1378_v57 }
 0x1b1   :  { %v3247_v12 = vsub.f32 %v1384_v60, %v3221_v3  ;;  %v3250_v23 = vand.u32 4294901760, %v1381_v33  ;;  %v1089_v11 = vadd.f32 %v3163_v30, %v3127_v18  ;;  %v1316_v20 = vmul.f32 %v1263_v2, %v25_v51  ;;  %v21_v51 = vld [vmem:[%s3676_s1 + $0x20] sm:$0xff] }
 0x1b2   :  { %v1338_v52 = vmul.f32 %v1322_v5, %v47_v1  ;;  %v1390_v41 = vsel %vm1340_vm3, %v1339_v31, 0  ;;  %v1375_v53 = vsel %vm1340_vm3, %v1334_v42, 0  ;;  %v1083_v35 = vadd.f32 %v3153_v19, %v3119_v44  ;;  %v23_v5 = vld [vmem:[%s3676_s1 + $0x30] sm:$0xff] }
 0x1b3   :  { %v3219_v25 = vand.u32 4294901760, %v1390_v41  ;;  %v3269_v6 = vsub.f32 %v1381_v33, %v3250_v23  ;;  %v1500_v39 = vand.u32 4294901760, %v3247_v12  ;;  %v1315_v34 = vmul.f32 %v1257_v38, %v24_v37 }
 0x1b4   :  { %v1387_v43 = vsel %vm1340_vm3, %v1338_v52, 0  ;;  %v3287_v18 = vsub.f32 %v1378_v57, %v3263_v62  ;;  %v1372_v30 = vsel %vm1340_vm3, %v1333_v55, 0  ;;  %v3296_v44 = vand.u32 4294901760, %v1375_v53  ;;  %v20_v55 = vld [vmem:[%s3676_s1 + $0x18] sm:$0xff] }
 0x1b5   :  { %2466 = vmatpush3.xpose.msra.mxu0 %v3219_v25  ;;  %v3232_v63 = vsub.f32 %v1390_v41, %v3219_v25  ;;  %v3234_v8 = vand.u32 4294901760, %v1387_v43  ;;  %v1501_v1 = vsub.f32 %v3247_v12, %v1500_v39  ;;  %v1507_v19 = vand.u32 4294901760, %v3269_v6 }
 0x1b6   :  { %2467 = vmatprep.subr.mxu0 %v2682_v28  ;;  %v1251_v17 = vadd.f32 %v3147_v26, %v1089_v11  ;;  %v1332_v31 = vmul.f32 %v1316_v20, %v41_v15  ;;  %v1245_v60 = vadd.f32 %v3137_v47, %v1083_v35  ;;  %v1331_v24 = vmul.f32 %v1315_v34, %v40_v50  ;;  %v22_v26 = vld [vmem:[%s3676_s1 + $0x28] sm:$0xff] }
 0x1b7   :  { %v3244_v46 = vsub.f32 %v1387_v43, %v3234_v8  ;;  %v1486_v21 = vand.u32 4294901760, %v3232_v63  ;;  %v3307_v49 = vand.u32 4294901760, %v1372_v30  ;;  %v1502_v4 = vand.u32 4294901760, %v1501_v1  ;;  %v39_v43 = vld [vmem:[%s3677_s2 + $0x30] sm:$0xff] }
 0x1b8   :  { %v3313_v52 = vsub.f32 %v1375_v53, %v3296_v44  ;;  %v1508_v41 = vsub.f32 %v3269_v6, %v1507_v19  ;;  %v1514_v47 = vand.u32 4294901760, %v3287_v18  ;;  %v1314_v54 = vmul.f32 %v1251_v17, %v23_v5  ;;  %v37_v53 = vld [vmem:[%s3677_s2 + $0x20] sm:$0xff] }
 0x1b9   :  { %2468 = vmatpush3.xpose.msra.mxu0 %v3234_v8  ;;  %v1487_v9 = vsub.f32 %v3232_v63, %v1486_v21  ;;  %v1493_v29 = vand.u32 4294901760, %v3244_v46  ;;  %v1369_v16 = vsel %vm1340_vm3, %v1332_v31, 0  ;;  %v1313_v33 = vmul.f32 %v1245_v60, %v22_v26  ;;  %v19_v31 = vld [vmem:[%s3676_s1 + $0x10] sm:$0xff] }
 0x1ba   :  { %2469 = vmatprep.subr.mxu0 %v2682_v28  ;;  %v3329_v14 = vsub.f32 %v1372_v30, %v3307_v49  ;;  %v1366_v56 = vsel %vm1340_vm3, %v1331_v24, 0  ;;  %v1509_v22 = vand.u32 4294901760, %v1508_v41  ;;  %v1515_v45 = vsub.f32 %v3287_v18, %v1514_v47  ;;  %v36_v30 = vld [vmem:[%s3677_s2 + $0x18] sm:$0xff]  ;;  %v18_v24 = vld [vmem:[%s3676_s1 + $0x8] sm:$0xff] }
 0x1bb   :  { %v1488_v7 = vand.u32 4294901760, %v1487_v9  ;;  %v1494_v40 = vsub.f32 %v3244_v46, %v1493_v29  ;;  %v3338_v57 = vand.u32 4294901760, %v1369_v16  ;;  %v1521_v32 = vand.u32 4294901760, %v3313_v52 }
 0x1bc   :  { %v1239_v2 = vadd.f32 %v3139_v59, %v1077_v48  ;;  %v1330_v42 = vmul.f32 %v1314_v54, %v39_v43  ;;  %v1329_v9 = vmul.f32 %v1313_v33, %v38_v27  ;;  %v3348_v38 = vand.u32 4294901760, %v1366_v56  ;;  %v35_v43 = vld [vmem:[%s3677_s2 + $0x10] sm:$0xff]  ;;  %v34_v27 = vld [vmem:[%s3677_s2 + $0x8] sm:$0xff] }
 0x1bd   :  { %2470 = vmatpush3.xpose.msra.mxu0 %v3221_v3  ;;  %2501 = vmatpush3.xpose.msra.mxu1 %v1488_v7  ;;  %v1495_v58 = vand.u32 4294901760, %v1494_v40  ;;  %v1516_v59 = vand.u32 4294901760, %v1515_v45  ;;  %v3354_v37 = vsub.f32 %v1369_v16, %v3338_v57  ;;  %v1522_v7 = vsub.f32 %v3313_v52, %v1521_v32 }
 0x1be   :  { %2471 = vmatprep.subr.mxu0 %v2682_v28  ;;  %2502 = vmatprep.subr.mxu1 %v2682_v28  ;;  %v1528_v40 = vand.u32 4294901760, %v3329_v14  ;;  %v1312_v11 = vmul.f32 %v1239_v2, %v21_v51  ;;  %v1363_v20 = vsel %vm1340_vm3, %v1330_v42, 0  ;;  %v1311_v15 = vmul.f32 %v3149_v13, %v20_v55  ;;  %v17_v51 = vld [vmem:[%s3676_s1] sm:$0xff] }
 0x1bf   :  { %v3369_v35 = vsub.f32 %v1366_v56, %v3348_v38  ;;  %v1360_v34 = vsel %vm1340_vm3, %v1329_v9, 0  ;;  %v1523_v50 = vand.u32 4294901760, %v1522_v7  ;;  %v3378_v1 = vand.u32 4294901760, %v1363_v20 }
 0x1c0   :  { %v1535_v13 = vand.u32 4294901760, %v3354_v37  ;;  %v1328_v17 = vmul.f32 %v1312_v11, %v37_v53  ;;  %v1327_v5 = vmul.f32 %v1311_v15, %v36_v30  ;;  %v3387_v60 = vand.u32 4294901760, %v1360_v34 }
 0x1c1   :  { %2472 = vmatpush3.xpose.msra.mxu0 %v3250_v23  ;;  %2503 = vmatpush3.xpose.msra.mxu1 %v1495_v58  ;;  %v1529_v58 = vsub.f32 %v3329_v14, %v1528_v40  ;;  %v1542_v48 = vand.u32 4294901760, %v3369_v35  ;;  %v1310_v54 = vmul.f32 %v3155_v36, %v19_v31  ;;  %v1309_v33 = vmul.f32 %v3141_v61, %v18_v24 }
 0x1c2   :  { %2473 = vmatprep.subr.mxu0 %v2682_v28  ;;  %2504 = vmatprep.subr.mxu1 %v2682_v28  ;;  %v1536_v41 = vsub.f32 %v3354_v37, %v1535_v13  ;;  %v1357_v16 = vsel %vm1340_vm3, %v1328_v17, 0  ;;  %v3409_v56 = vsub.f32 %v1360_v34, %v3387_v60  ;;  %v1354_v36 = vsel %vm1340_vm3, %v1327_v5, 0  ;;  %v33_v34 = vld [vmem:[%s3677_s2] sm:$0xff] }
 0x1c3   :  { %v1530_v26 = vand.u32 4294901760, %v1529_v58  ;;  %v1543_v45 = vsub.f32 %v3369_v35, %v1542_v48  ;;  %v3418_v2 = vand.u32 4294901760, %v1357_v16  ;;  %v1326_v42 = vmul.f32 %v1310_v54, %v35_v43 }
 0x1c4   :  { %v1325_v9 = vmul.f32 %v1309_v33, %v34_v27  ;;  %v3427_v55 = vand.u32 4294901760, %v1354_v36  ;;  %v1308_v53 = vmul.f32 %v3145_v10, %v17_v51  ;;  %v1342_v24 = vsel %vm1340_vm3, 1.0, %v2681_v0 }
 0x1c5   :  { %2474 = vmatpush3.xpose.msra.mxu0 %v3263_v62  ;;  %2505 = vmatpush3.xpose.msra.mxu1 %v1502_v4  ;;  %v3393_v4 = vsub.f32 %v1363_v20, %v3378_v1  ;;  %v3430_v7 = vsub.f32 %v1357_v16, %v3418_v2  ;;  %v1556_v20 = vand.u32 4294901760, %v3409_v56  ;;  %v1351_v15 = vsel %vm1340_vm3, %v1326_v42, 0 }
 0x1c6   :  { %2475 = vmatprep.subr.mxu0 %v2682_v28  ;;  %2506 = vmatprep.subr.mxu1 %v2682_v28  ;;  %v3445_v30 = vsub.f32 %v1354_v36, %v3427_v55  ;;  %v3451_v17 = vand.u32 4294901760, %v1351_v15  ;;  %v1324_v5 = vmul.f32 %v1308_v53, %v33_v34  ;;  %v3468_v0 = vsub.f32 %v1342_v24, %v1342_v24 }
 0x1c7   :  { %v1549_v61 = vand.u32 4294901760, %v3393_v4  ;;  %v1557_v10 = vsub.f32 %v3409_v56, %v1556_v20  ;;  %v1563_v31 = vand.u32 4294901760, %v3430_v7 }
 0x1c8   :  { %v3462_v54 = vsub.f32 %v1351_v15, %v3451_v17  ;;  %v1570_v43 = vand.u32 4294901760, %v3445_v30  ;;  %v1345_v33 = vsel %vm1340_vm3, %v1324_v5, 0  ;;  %v1475_v51 = vand.u32 4294901760, %v3468_v0 }
 0x1c9   :  { %2476 = vmatpush3.xpose.msra.mxu0 %v3296_v44  ;;  %2507 = vmatpush3.xpose.msra.mxu1 %v1509_v22  ;;  %v1537_v22 = vand.u32 4294901760, %v1536_v41  ;;  %v1550_v11 = vsub.f32 %v3393_v4, %v1549_v61  ;;  %v1558_v41 = vand.u32 4294901760, %v1557_v10  ;;  %v1564_v16 = vsub.f32 %v3430_v7, %v1563_v31 }
 0x1ca   :  { %2477 = vmatprep.subr.mxu0 %v2682_v28  ;;  %2508 = vmatprep.subr.mxu1 %v2682_v28  ;;  %v1577_v42 = vand.u32 4294901760, %v3462_v54  ;;  %v1476_v15 = vsub.f32 %v3468_v0, %v1475_v51 }
 0x1cb   :  { %v1551_v58 = vand.u32 4294901760, %v1550_v11  ;;  %v1565_v27 = vand.u32 4294901760, %v1564_v16  ;;  %v2684_v16 = vmov 1.0  }
 0x1cc   :  { %v1578_v11 = vsub.f32 %v3462_v54, %v1577_v42  ;;  %v1477_v10 = vand.u32 4294901760, %v1476_v15 }
 0x1cd   :  { %2478 = vmatpush3.xpose.msra.mxu0 %v3307_v49  ;;  %2509 = vmatpush3.xpose.msra.mxu1 %v1516_v59  ;;  %v1544_v59 = vand.u32 4294901760, %v1543_v45  ;;  %v3480_v45 = vand.u32 4294901760, %v1345_v33 }
 0x1ce   :  { %2479 = vmatprep.subr.mxu0 %v2682_v28  ;;  %2510 = vmatprep.subr.mxu1 %v2682_v28  ;;  %v1579_v34 = vand.u32 4294901760, %v1578_v11 }
 0x1d1   :  { %2480 = vmatpush3.xpose.msra.mxu0 %v3338_v57  ;;  %2511 = vmatpush3.xpose.msra.mxu1 %v1523_v50  ;;  %v1348_v50 = vsel %vm1340_vm3, %v1325_v9, 0 }
 0x1d2   :  { %2481 = vmatprep.subr.mxu0 %v2682_v28  ;;  %2512 = vmatprep.subr.mxu1 %v2682_v28 }
 0x1d5   :  { %2482 = vmatpush3.xpose.msra.mxu0 %v3348_v38  ;;  %2513 = vmatpush3.xpose.msra.mxu1 %v1530_v26  ;;  %v3459_v26 = vand.u32 4294901760, %v1348_v50 }
 0x1d6   :  { %2483 = vmatprep.subr.mxu0 %v2682_v28  ;;  %2514 = vmatprep.subr.mxu1 %v2682_v28 }
 0x1d7   :  { %v3475_v36 = vsub.f32 %v1348_v50, %v3459_v26 }
 0x1d9   :  { %2484 = vmatpush3.xpose.msra.mxu0 %v3378_v1  ;;  %2515 = vmatpush3.xpose.msra.mxu1 %v1537_v22  ;;  %v1571_v22 = vsub.f32 %v3445_v30, %v1570_v43  ;;  %v1584_v53 = vand.u32 4294901760, %v3475_v36 }
 0x1da   :  { %2485 = vmatprep.subr.mxu0 %v2682_v28  ;;  %2516 = vmatprep.subr.mxu1 %v2682_v28 }
 0x1db   :  { %v1572_v9 = vand.u32 4294901760, %v1571_v22  ;;  %v1585_v50 = vsub.f32 %v3475_v36, %v1584_v53 }
 0x1dd   :  { %2486 = vmatpush3.xpose.msra.mxu0 %v3387_v60  ;;  %2517 = vmatpush3.xpose.msra.mxu1 %v1544_v59  ;;  %v3488_v59 = vsub.f32 %v1345_v33, %v3480_v45  ;;  %v1586_v5 = vand.u32 4294901760, %v1585_v50 }
 0x1de   :  { %2487 = vmatprep.subr.mxu0 %v2682_v28  ;;  %2518 = vmatprep.subr.mxu1 %v2682_v28 }
 0x1e1   :  { %2488 = vmatpush3.xpose.msra.mxu0 %v3418_v2  ;;  %2519 = vmatpush3.xpose.msra.mxu1 %v1551_v58  ;;  %v1591_v58 = vand.u32 4294901760, %v3488_v59 }
 0x1e2   :  { %2489 = vmatprep.subr.mxu0 %v2682_v28  ;;  %2520 = vmatprep.subr.mxu1 %v2682_v28 }
 0x1e3   :  { %v1592_v24 = vsub.f32 %v3488_v59, %v1591_v58 }
 0x1e5   :  { %2490 = vmatpush3.xpose.msra.mxu0 %v3427_v55  ;;  %2521 = vmatpush3.xpose.msra.mxu1 %v1558_v41  ;;  %v1593_v41 = vand.u32 4294901760, %v1592_v24 }
 0x1e6   :  { %2491 = vmatprep.subr.mxu0 %v2682_v28  ;;  %2522 = vmatprep.subr.mxu1 %v2682_v28 }
 0x1e9   :  { %2492 = vmatpush3.xpose.msra.mxu0 %v3451_v17  ;;  %2523 = vmatpush3.xpose.msra.mxu1 %v1565_v27 }
 0x1ea   :  { %2493 = vmatprep.subr.mxu0 %v2682_v28  ;;  %2524 = vmatprep.subr.mxu1 %v2682_v28 }
 0x1ed   :  { %2494 = vmatpush3.xpose.msra.mxu0 %v3459_v26  ;;  %2525 = vmatpush3.xpose.msra.mxu1 %v1572_v9 }
 0x1ee   :  { %2495 = vmatprep.subr.mxu0 %v2682_v28  ;;  %2526 = vmatprep.subr.mxu1 %v2682_v28 }
 0x1f1   :  { %2496 = vmatpush3.xpose.msra.mxu0 %v3480_v45  ;;  %2527 = vmatpush3.xpose.msra.mxu1 %v1579_v34 }
 0x1f2   :  { %2528 = vmatprep.subr.mxu1 %v2682_v28  ;;  %2535 = vmatprep.subr.mxu0 %v2682_v28 }
 0x1f4   :  { %2498 = vmatmul.mubr.f32.vlgmr.msra.gmra.mxu0 %v1477_v10 }
 0x1f5   :  { %2529 = vmatpush3.xpose.msra.mxu1 %v1586_v5  ;;  %2536 = vmatpush3.xpose.msra.mxu0 %v3232_v63 }
 0x1f6   :  { %2530 = vmatprep.subr.mxu1 %v2682_v28  ;;  %2537 = vmatprep.subr.mxu0 %v2682_v28 }
 0x1f7   :  { %2567 = vmatprep.mubr.msk.f32.mxu0 %vm2683_vm1, %v2682_v28 }
 0x1f9   :  { %2531 = vmatpush3.xpose.msra.mxu1 %v1593_v41  ;;  %2538 = vmatpush3.xpose.msra.mxu0 %v3244_v46 }
 0x1fa   :  { %2539 = vmatprep.subr.mxu0 %v2682_v28  ;;  %2570 = vmatprep.subr.mxu1 %v2682_v28 }
 0x1fc   :  { %2533 = vmatmul.mubr.msk.f32.vlgmr.msra.gmra.mxu1 %vm1340_vm3, %v2684_v16 }
 0x1fd   :  { %2540 = vmatpush3.xpose.msra.mxu0 %v3247_v12  ;;  %2571 = vmatpush3.xpose.msra.mxu1 %v3219_v25 }
 0x1fe   :  { %2541 = vmatprep.subr.mxu0 %v2682_v28  ;;  %2572 = vmatprep.subr.mxu1 %v2682_v28 }
 0x1ff   :  { %2602 = vmatprep.mubr.msk.f32.mxu1 %vm2683_vm1, %v2682_v28 }
 0x201   :  { %2542 = vmatpush3.xpose.msra.mxu0 %v3269_v6  ;;  %2573 = vmatpush3.xpose.msra.mxu1 %v3234_v8 }
 0x202   :  { %2543 = vmatprep.subr.mxu0 %v2682_v28  ;;  %2574 = vmatprep.subr.mxu1 %v2682_v28 }
 0x205   :  { %2544 = vmatpush3.xpose.msra.mxu0 %v3287_v18  ;;  %2575 = vmatpush3.xpose.msra.mxu1 %v3221_v3 }
 0x206   :  { %2545 = vmatprep.subr.mxu0 %v2682_v28  ;;  %2576 = vmatprep.subr.mxu1 %v2682_v28 }
 0x209   :  { %2546 = vmatpush3.xpose.msra.mxu0 %v3313_v52  ;;  %2577 = vmatpush3.xpose.msra.mxu1 %v3250_v23 }
 0x20a   :  { %2547 = vmatprep.subr.mxu0 %v2682_v28  ;;  %2578 = vmatprep.subr.mxu1 %v2682_v28 }
 0x20d   :  { %2548 = vmatpush3.xpose.msra.mxu0 %v3329_v14  ;;  %2579 = vmatpush3.xpose.msra.mxu1 %v3263_v62 }
 0x20e   :  { %2549 = vmatprep.subr.mxu0 %v2682_v28  ;;  %2580 = vmatprep.subr.mxu1 %v2682_v28 }
 0x211   :  { %2550 = vmatpush3.xpose.msra.mxu0 %v3354_v37  ;;  %2581 = vmatpush3.xpose.msra.mxu1 %v3296_v44 }
 0x212   :  { %2551 = vmatprep.subr.mxu0 %v2682_v28  ;;  %2582 = vmatprep.subr.mxu1 %v2682_v28 }
 0x215   :  { %2552 = vmatpush3.xpose.msra.mxu0 %v3369_v35  ;;  %2583 = vmatpush3.xpose.msra.mxu1 %v3307_v49 }
 0x216   :  { %2553 = vmatprep.subr.mxu0 %v2682_v28  ;;  %2584 = vmatprep.subr.mxu1 %v2682_v28 }
 0x219   :  { %2554 = vmatpush3.xpose.msra.mxu0 %v3393_v4  ;;  %2585 = vmatpush3.xpose.msra.mxu1 %v3338_v57 }
 0x21a   :  { %2555 = vmatprep.subr.mxu0 %v2682_v28  ;;  %2586 = vmatprep.subr.mxu1 %v2682_v28 }
 0x21d   :  { %2556 = vmatpush3.xpose.msra.mxu0 %v3409_v56  ;;  %2587 = vmatpush3.xpose.msra.mxu1 %v3348_v38 }
 0x21e   :  { %2557 = vmatprep.subr.mxu0 %v2682_v28  ;;  %2588 = vmatprep.subr.mxu1 %v2682_v28 }
 0x221   :  { %2558 = vmatpush3.xpose.msra.mxu0 %v3430_v7  ;;  %2589 = vmatpush3.xpose.msra.mxu1 %v3378_v1 }
 0x222   :  { %2559 = vmatprep.subr.mxu0 %v2682_v28  ;;  %2590 = vmatprep.subr.mxu1 %v2682_v28 }
 0x225   :  { %2560 = vmatpush3.xpose.msra.mxu0 %v3445_v30  ;;  %2591 = vmatpush3.xpose.msra.mxu1 %v3387_v60 }
 0x226   :  { %2561 = vmatprep.subr.mxu0 %v2682_v28  ;;  %2592 = vmatprep.subr.mxu1 %v2682_v28 }
 0x229   :  { %2562 = vmatpush3.xpose.msra.mxu0 %v3462_v54  ;;  %2593 = vmatpush3.xpose.msra.mxu1 %v3418_v2 }
 0x22a   :  { %2563 = vmatprep.subr.mxu0 %v2682_v28  ;;  %2594 = vmatprep.subr.mxu1 %v2682_v28 }
 0x22d   :  { %2564 = vmatpush3.xpose.msra.mxu0 %v3475_v36  ;;  %2595 = vmatpush3.xpose.msra.mxu1 %v3427_v55 }
 0x22e   :  { %2565 = vmatprep.subr.mxu0 %v2682_v28  ;;  %2596 = vmatprep.subr.mxu1 %v2682_v28 }
 0x231   :  { %2566 = vmatpush3.xpose.msra.mxu0 %v3488_v59  ;;  %2597 = vmatpush3.xpose.msra.mxu1 %v3451_v17 }
 0x232   :  { %2598 = vmatprep.subr.mxu1 %v2682_v28  ;;  %2605 = vmatprep.subr.mxu0 %v2682_v28 }
 0x234   :  { %2568 = vmatmul.mubr.f32.vlgmr.msra.gmra.mxu0 %v3468_v0 }
 0x235   :  { %2599 = vmatpush3.xpose.msra.mxu1 %v3459_v26  ;;  %2606 = vmatpush3.xpose.msra.mxu0 %v1486_v21 }
 0x236   :  { %2600 = vmatprep.subr.mxu1 %v2682_v28  ;;  %2607 = vmatprep.subr.mxu0 %v2682_v28 }
 0x237   :  { %2637 = vmatprep.mubr.msk.f32.mxu0 %vm2683_vm1, %v2682_v28 }
 0x239   :  { %2601 = vmatpush3.xpose.msra.mxu1 %v3480_v45  ;;  %2608 = vmatpush3.xpose.msra.mxu0 %v1493_v29 }
 0x23a   :  { %2609 = vmatprep.subr.mxu0 %v2682_v28  ;;  %2640 = vmatprep.subr.mxu1 %v2682_v28 }
 0x23c   :  { %2603 = vmatmul.mubr.f32.vlgmr.msra.gmra.mxu1 %v1475_v51 }
 0x23d   :  { %2610 = vmatpush3.xpose.msra.mxu0 %v1500_v39  ;;  %2641 = vmatpush3.xpose.msra.mxu1 %v3219_v25 }
 0x23e   :  { %2611 = vmatprep.subr.mxu0 %v2682_v28  ;;  %2642 = vmatprep.subr.mxu1 %v2682_v28 }
 0x23f   :  { %2672 = vmatprep.mubr.msk.f32.mxu1 %vm2683_vm1, %v2682_v28 }
 0x241   :  { %2612 = vmatpush3.xpose.msra.mxu0 %v1507_v19  ;;  %2643 = vmatpush3.xpose.msra.mxu1 %v3234_v8 }
 0x242   :  { %2613 = vmatprep.subr.mxu0 %v2682_v28  ;;  %2644 = vmatprep.subr.mxu1 %v2682_v28 }
 0x245   :  { %2614 = vmatpush3.xpose.msra.mxu0 %v1514_v47  ;;  %2645 = vmatpush3.xpose.msra.mxu1 %v3221_v3 }
 0x246   :  { %2615 = vmatprep.subr.mxu0 %v2682_v28  ;;  %2646 = vmatprep.subr.mxu1 %v2682_v28 }
 0x249   :  { %2616 = vmatpush3.xpose.msra.mxu0 %v1521_v32  ;;  %2647 = vmatpush3.xpose.msra.mxu1 %v3250_v23 }
 0x24a   :  { %2617 = vmatprep.subr.mxu0 %v2682_v28  ;;  %2648 = vmatprep.subr.mxu1 %v2682_v28 }
 0x24d   :  { %2618 = vmatpush3.xpose.msra.mxu0 %v1528_v40  ;;  %2649 = vmatpush3.xpose.msra.mxu1 %v3263_v62 }
 0x24e   :  { %2619 = vmatprep.subr.mxu0 %v2682_v28  ;;  %2650 = vmatprep.subr.mxu1 %v2682_v28 }
 0x251   :  { %2620 = vmatpush3.xpose.msra.mxu0 %v1535_v13  ;;  %2651 = vmatpush3.xpose.msra.mxu1 %v3296_v44 }
 0x252   :  { %2621 = vmatprep.subr.mxu0 %v2682_v28  ;;  %2652 = vmatprep.subr.mxu1 %v2682_v28 }
 0x255   :  { %2622 = vmatpush3.xpose.msra.mxu0 %v1542_v48  ;;  %2653 = vmatpush3.xpose.msra.mxu1 %v3307_v49 }
 0x256   :  { %2623 = vmatprep.subr.mxu0 %v2682_v28  ;;  %2654 = vmatprep.subr.mxu1 %v2682_v28 }
 0x259   :  { %2624 = vmatpush3.xpose.msra.mxu0 %v1549_v61  ;;  %2655 = vmatpush3.xpose.msra.mxu1 %v3338_v57 }
 0x25a   :  { %2625 = vmatprep.subr.mxu0 %v2682_v28  ;;  %2656 = vmatprep.subr.mxu1 %v2682_v28 }
 0x25d   :  { %2626 = vmatpush3.xpose.msra.mxu0 %v1556_v20  ;;  %2657 = vmatpush3.xpose.msra.mxu1 %v3348_v38 }
 0x25e   :  { %2627 = vmatprep.subr.mxu0 %v2682_v28  ;;  %2658 = vmatprep.subr.mxu1 %v2682_v28 }
 0x261   :  { %2628 = vmatpush3.xpose.msra.mxu0 %v1563_v31  ;;  %2659 = vmatpush3.xpose.msra.mxu1 %v3378_v1 }
 0x262   :  { %2629 = vmatprep.subr.mxu0 %v2682_v28  ;;  %2660 = vmatprep.subr.mxu1 %v2682_v28 }
 0x265   :  { %2630 = vmatpush3.xpose.msra.mxu0 %v1570_v43  ;;  %2661 = vmatpush3.xpose.msra.mxu1 %v3387_v60 }
 0x266   :  { %2631 = vmatprep.subr.mxu0 %v2682_v28  ;;  %2662 = vmatprep.subr.mxu1 %v2682_v28 }
 0x269   :  { %2632 = vmatpush3.xpose.msra.mxu0 %v1577_v42  ;;  %2663 = vmatpush3.xpose.msra.mxu1 %v3418_v2 }
 0x26a   :  { %2633 = vmatprep.subr.mxu0 %v2682_v28  ;;  %2664 = vmatprep.subr.mxu1 %v2682_v28 }
 0x26d   :  { %2634 = vmatpush3.xpose.msra.mxu0 %v1584_v53  ;;  %2665 = vmatpush3.xpose.msra.mxu1 %v3427_v55 }
 0x26e   :  { %2635 = vmatprep.subr.mxu0 %v2682_v28  ;;  %2666 = vmatprep.subr.mxu1 %v2682_v28 }
 0x271   :  { %2636 = vmatpush3.xpose.msra.mxu0 %v1591_v58  ;;  %2667 = vmatpush3.xpose.msra.mxu1 %v3451_v17 }
 0x272   :  { %2668 = vmatprep.subr.mxu1 %v2682_v28 }
 0x274   :  { %2638 = vmatmul.mubr.msk.f32.vlgmr.msra.gmra.mxu0 %vm1340_vm3, %v2684_v16 }
 0x275   :  { %2669 = vmatpush3.xpose.msra.mxu1 %v3459_v26 }
 0x276   :  { %2670 = vmatprep.subr.mxu1 %v2682_v28 }
 0x279   :  { %2671 = vmatpush3.xpose.msra.mxu1 %v3480_v45 }
 0x27c   :  { %2673 = vmatmul.mubr.msk.f32.vlgmr.msra.gmra.mxu1 %vm1340_vm3, %v2684_v16 }
 0x2b4   :  { %v1479_v25 = vpop.f32.mrf.mxu0 }
 0x2b6   :  { %v2499_v3 = vpop.f32.mrf.mxu0 }
 0x2bc   :  { %v1630_v63 = vpop.f32.mrf.mxu1 }
 0x2bd   :  { %v1631_v8 = vadd.f32 %v1630_v63, %v1479_v25 }
 0x2be   :  { %v2534_v46 = vpop.f32.mrf.mxu1 }
 0x2f4   :  { %v1734_v12 = vpop.f32.mrf.mxu0 }
 0x2f5   :  { %v1735_v21 = vadd.f32 %v1734_v12, %v1631_v8 }
 0x2f6   :  { %v2569_v23 = vpop.f32.mrf.mxu0 }
 0x2fc   :  { %v1823_v29 = vpop.f32.mrf.mxu1 }
 0x2fd   :  { %v1824_v18 = vadd.f32 %v1823_v29, %v1735_v21 }
 0x2fe   :  { %v2604_v62 = vpop.f32.mrf.mxu1 }
 0x334   :  { %v1942_v6 = vpop.f32.mrf.mxu0 }
 0x335   :  { %v1943_v44 = vadd.f32 %v1942_v6, %v1824_v18 }
 0x336   :  { %v2639_v39 = vpop.f32.mrf.mxu0 }
 0x33c   :  { %v2029_v28 = vpop.f32.mrf.mxu1 }
 0x33d   :  { %v2030_v19 = vadd.f32 %v2029_v28, %v1943_v44 }
 0x33e   :  { %v2674_v49 = vpop.f32.mrf.mxu1 }
 0x33f   :  { %2033 = vst [vmem:[%s3678_s4] sm:$0x1] %v2030_v19 }

</bundles_post_ra>
